<compile_context>
chip_gen: v7x
topology: tpu7x:2x2x1
jax: 0.10.0
libtpu: 0.0.40
codegen_flags: <defaults>
</compile_context>

<pallas_src>
import math
import functools

import jax
import jax.numpy as jnp
import numpy as np
from jax.experimental import pallas as pl
from jax.experimental.pallas import tpu as pltpu


def _mhsa_kernel(*refs, num_heads, head_dim, mask_kind):
    """One grid step == one batch element.

    refs (mask_kind in {"shared","batched"}):
        x, wqkv, bqkv, wo, bo, mask, out, ctx_scratch
    refs (mask_kind in {"none","causal"}):
        x, wqkv, bqkv, wo, bo, out, ctx_scratch

    x_ref:    (1, S, E) f32
    wqkv_ref: (E, 3E)   bf16   (columns: [Wq | Wk | Wv])
    bqkv_ref: (1, 3E)   f32
    wo_ref:   (E, E)    bf16
    bo_ref:   (1, E)    f32
    mask_ref: (S, S) or (1, S, S) additive mask (only for shared/batched)
    o_ref:    (1, S, E)
    ctx_ref:  (S, E)    bf16 VMEM scratch (assembled per-head contexts)
    """
    if mask_kind in ("shared", "batched"):
        x_ref, wqkv_ref, bqkv_ref, wo_ref, bo_ref, mask_ref, o_ref, ctx_ref = refs
    else:
        x_ref, wqkv_ref, bqkv_ref, wo_ref, bo_ref, o_ref, ctx_ref = refs
        mask_ref = None

    H, D = num_heads, head_dim
    E = H * D
    S = x_ref.shape[1]

    # ---- fused QKV projection: one wide (S, E) @ (E, 3E) MXU pass ----------
    x_bf = x_ref[0].astype(jnp.bfloat16)                            # (S, E)
    qkv = jnp.dot(x_bf, wqkv_ref[...],
                  preferred_element_type=jnp.float32) + bqkv_ref[...]   # (S, 3E) f32

    # Fold the 1/sqrt(D) softmax scale into Q (S*E muls instead of H*S*S).
    scale = 1.0 / math.sqrt(D)
    q_bf = (qkv[:, :E] * scale).astype(jnp.bfloat16)                # (S, E)
    k_bf = qkv[:, E:2 * E].astype(jnp.bfloat16)                     # (S, E)
    v_bf = qkv[:, 2 * E:3 * E].astype(jnp.bfloat16)                 # (S, E)

    # Additive attention mask shared by all heads (built / loaded ONCE).
    if mask_kind == "causal":
        # Generated in-kernel: zero HBM traffic, zero VMEM double-buffering.
        row = jax.lax.broadcasted_iota(jnp.int32, (S, S), 0)
        col = jax.lax.broadcasted_iota(jnp.int32, (S, S), 1)
        add_mask = jnp.where(col <= row, 0.0, -1e9).astype(jnp.float32)
    elif mask_kind == "shared":
        add_mask = mask_ref[...].astype(jnp.float32)                # (S, S)
    elif mask_kind == "batched":
        add_mask = mask_ref[0].astype(jnp.float32)                  # (S, S)
    else:
        add_mask = None

    # ---- per-head attention; contexts assembled into the (S, E) scratch ----
    for h in range(H):
        lo = h * D
        qh = q_bf[:, lo:lo + D]                                     # (S, D)
        kh = k_bf[:, lo:lo + D]                                     # (S, D)
        vh = v_bf[:, lo:lo + D]                                     # (S, D)

        s = jnp.dot(qh, kh.T, preferred_element_type=jnp.float32)   # (S, S) f32
        if add_mask is not None:
            s = s + add_mask
        s = s - jnp.max(s, axis=-1, keepdims=True)
        p = jnp.exp(s)                                              # f32 (v5e-safe)
        denom = jnp.sum(p, axis=-1, keepdims=True)                  # (S, 1)

        # TODO(synk): attention-weight dropout is identity in eval mode.
        ctx_h = jnp.dot(p.astype(jnp.bfloat16), vh,
                        preferred_element_type=jnp.float32)         # (S, D)
        # Deferred softmax normalisation: scale the small (S, D) result, not
        # the (S, S) probabilities; approx reciprocal runs on the EUP slot.
        ctx_h = ctx_h * pl.reciprocal(denom, approx=True)

        ctx_ref[:, lo:lo + D] = ctx_h.astype(jnp.bfloat16)

    # ---- single full-depth output projection (K = E, one MXU pass) ---------
    out = jnp.dot(ctx_ref[...], wo_ref[...],
                  preferred_element_type=jnp.float32) + bo_ref[...]  # (S, E)
    # NOTE: E=32 < 128 lanes -> masked partial stores; acceptable at this
    # scale (a lane-dense repack would cost an in-kernel relayout).
    o_ref[0] = out.astype(o_ref.dtype)


def pack_mhsa_params(params):
    """One-time pre-pack of the four Linear layers (hoisted out of the
    per-call path): fuse Wq|Wk|Wv into a single (E, 3E) bf16 weight (one wide
    MXU pass, half the weight DMA); biases stay f32 (added post-accumulation)."""
    return dict(
        wqkv=jnp.concatenate([params["wq"], params["wk"], params["wv"]],
                             axis=1).astype(jnp.bfloat16),
        bqkv=jnp.concatenate([params["bq"], params["bk"], params["bv"]],
                             axis=1).astype(jnp.float32),
        wo=params["wo"].astype(jnp.bfloat16),
        bo=params["bo"].astype(jnp.float32),
    )


def _vmem_bytes_estimate(S, E, H, mask_kind):
    """Rough per-grid-step working set: double-buffered I/O blocks + the big
    in-kernel f32 intermediates. Only used to decide whether the scoped VMEM
    default needs raising (never request the whole physical VMEM)."""
    f32, bf16 = 4, 2
    io = 2 * (S * E * f32)                        # x block + out block
    io += (E * 3 * E + E * E) * bf16 + 4 * E * f32  # fused weights + biases
    if mask_kind in ("shared", "batched"):
        io += S * S * f32
    interm = S * 3 * E * f32 + 3 * S * E * bf16   # qkv f32 + q/k/v bf16
    interm += 2 * S * S * f32                     # scores + exp (one head live)
    interm += S * E * (bf16 + f32)                # ctx scratch + f32 out
    return 2 * io + interm                        # ~2x for double buffering


def multi_head_self_attention(x, packed, num_heads, attention_mask=None,
                              causal=False):
    """x: (B, S, E) f32. packed: output of pack_mhsa_params.
    attention_mask: optional additive mask, shape (S, S) (batch-invariant,
    fetched once) or (B, S, S) (per batch element).
    causal=True generates a causal additive mask in-kernel (no HBM traffic)."""
    B, S, E = x.shape
    head_dim = E // num_heads

    if causal and attention_mask is not None:
        raise ValueError("pass either causal=True or attention_mask, not both")
    if causal:
        mask_kind = "causal"
    elif attention_mask is None:
        mask_kind = "none"
    elif attention_mask.ndim == 2:
        mask_kind = "shared"
    else:
        mask_kind = "batched"

    kernel = functools.partial(_mhsa_kernel, num_heads=num_heads,
                               head_dim=head_dim, mask_kind=mask_kind)

    in_specs = [
        pl.BlockSpec((1, S, E), lambda b: (b, 0, 0)),        # x
        # TODO(synk): on v7x mark the grid-invariant weight blocks with
        # pipeline_mode=pl.Buffered(1) (or DMA once into scratch) so two
        # copies aren't kept resident; irrelevant at this scale.
        pl.BlockSpec((E, 3 * E), lambda b: (0, 0)),          # Wqkv (bf16)
        pl.BlockSpec((1, 3 * E), lambda b: (0, 0)),          # bqkv (f32)
        pl.BlockSpec((E, E), lambda b: (0, 0)),              # Wo   (bf16)
        pl.BlockSpec((1, E), lambda b: (0, 0)),              # bo   (f32)
    ]
    args = [x, packed["wqkv"], packed["bqkv"], packed["wo"], packed["bo"]]
    if mask_kind == "shared":
        in_specs.append(pl.BlockSpec((S, S), lambda b: (0, 0)))      # fetched once
        args.append(attention_mask)
    elif mask_kind == "batched":
        in_specs.append(pl.BlockSpec((1, S, S), lambda b: (b, 0, 0)))
        args.append(attention_mask)

    # Only raise the scoped-VMEM default when needed; cap at 48 MiB so v7x
    # (64 MiB physical per TC) keeps headroom for compiler scratch.
    est = _vmem_bytes_estimate(S, E, num_heads, mask_kind)
    vmem_limit = min(int(est * 1.25), 48 * 1024 * 1024) if est > (32 << 20) else None

    return pl.pallas_call(
        kernel,
        out_shape=jax.ShapeDtypeStruct((B, S, E), x.dtype),
        grid_spec=pltpu.PrefetchScalarGridSpec(
            num_scalar_prefetch=0,
            grid=(B,),
            in_specs=in_specs,
            out_specs=pl.BlockSpec((1, S, E), lambda b: (b, 0, 0)),
            scratch_shapes=[pltpu.VMEM((S, E), jnp.bfloat16)],   # assembled heads
        ),
        compiler_params=pltpu.CompilerParams(
            # "parallel" B axis shards across v7x's 2 TensorCores; no-op on
            # v5e/v6e (single TC).
            dimension_semantics=("parallel",),
            vmem_limit_bytes=vmem_limit),
    )(*args)


def _reference(x, params, num_heads, attention_mask=None):
    """Plain-JAX f32 reference matching the PyTorch forward."""
    B, S, E = x.shape
    D = E // num_heads
    q = x @ params["wq"] + params["bq"]
    k = x @ params["wk"] + params["bk"]
    v = x @ params["wv"] + params["bv"]
    q = q.reshape(B, S, num_heads, D).transpose(0, 2, 1, 3)
    k = k.reshape(B, S, num_heads, D).transpose(0, 2, 1, 3)
    v = v.reshape(B, S, num_heads, D).transpose(0, 2, 1, 3)
    s = jnp.einsum("bhqd,bhkd->bhqk", q, k) / math.sqrt(D)
    if attention_mask is not None:
        s = s + attention_mask[:, None, :, :]
    p = jax.nn.softmax(s, axis=-1)
    o = jnp.einsum("bhqk,bhkd->bhqd", p, v)
    o = o.transpose(0, 2, 1, 3).reshape(B, S, E)
    return o @ params["wo"] + params["bo"]


if __name__ == "__main__":
    # Small shapes consistent with the module's forward.
    B, S, E, H = 2, 8, 32, 4

    key = jax.random.PRNGKey(0)
    keys = jax.random.split(key, 10)

    def linear_params(kw, kb, fan_in, fan_out):
        bound = 1.0 / math.sqrt(fan_in)
        w = jax.random.uniform(kw, (fan_in, fan_out), jnp.float32, -bound, bound)
        b = jax.random.uniform(kb, (1, fan_out), jnp.float32, -bound, bound)
        return w, b

    wq, bq = linear_params(keys[0], keys[1], E, E)
    wk, bk = linear_params(keys[2], keys[3], E, E)
    wv, bv = linear_params(keys[4], keys[5], E, E)
    wo, bo = linear_params(keys[6], keys[7], E, E)
    params = dict(wq=wq, bq=bq, wk=wk, bk=bk, wv=wv, bv=bv, wo=wo, bo=bo)

    packed = pack_mhsa_params(params)        # one-time pre-pack (not per call)

    x = jax.random.normal(keys[8], (B, S, E), jnp.float32)

    # bf16 matmul inputs (f32 accumulation) vs f32 reference -> loose tolerance.
    tol = dict(rtol=2e-2, atol=2e-2)

    # 1) no mask
    out = jax.block_until_ready(
        multi_head_self_attention(x, packed, num_heads=H))
    ref = _reference(x, params, num_heads=H)
    np.testing.assert_allclose(np.asarray(out), np.asarray(ref), **tol)

    # Reference causal additive mask (for comparing all masked variants).
    causal_2d = jnp.where(jnp.arange(S)[None, :] <= jnp.arange(S)[:, None],
                          0.0, -1e9).astype(jnp.float32)
    mask_b = jnp.broadcast_to(causal_2d, (B, S, S))
    ref_m = _reference(x, params, num_heads=H, attention_mask=mask_b)

    # 2) causal mask generated in-kernel (zero HBM mask traffic)
    out_c = jax.block_until_ready(
        multi_head_self_attention(x, packed, num_heads=H, causal=True))
    np.testing.assert_allclose(np.asarray(out_c), np.asarray(ref_m), **tol)

    # 3) batch-invariant (S, S) additive mask, fetched once
    out_s = jax.block_until_ready(
        multi_head_self_attention(x, packed, num_heads=H,
                                  attention_mask=causal_2d))
    np.testing.assert_allclose(np.asarray(out_s), np.asarray(ref_m), **tol)

    # 4) per-batch (B, S, S) additive mask (original module's general form)
    out_b = jax.block_until_ready(
        multi_head_self_attention(x, packed, num_heads=H,
                                  attention_mask=mask_b))
    np.testing.assert_allclose(np.asarray(out_b), np.asarray(ref_m), **tol)

    print("KERNEL_OK")
</pallas_src>

<mosaic_0001>
module attributes {stable_mosaic.version = 11 : i64} {
  func.func @_mhsa_kernel(%arg0: i32, %arg1: memref<1x8x32xf32, #tpu.memory_space<vmem>>, %arg2: memref<32x96xbf16, #tpu.memory_space<vmem>>, %arg3: memref<1x96xf32, #tpu.memory_space<vmem>>, %arg4: memref<32x32xbf16, #tpu.memory_space<vmem>>, %arg5: memref<1x32xf32, #tpu.memory_space<vmem>>, %arg6: memref<1x8x32xf32, #tpu.memory_space<vmem>>, %arg7: memref<8x32xbf16, #tpu.memory_space<vmem>>) attributes {dimension_semantics = [#tpu.dimension_semantics<parallel>], iteration_bounds = array<i64: 2>, scalar_prefetch = 0 : i64, scratch_operands = 1 : i64, tpu.core_type = #tpu.core_type<tc>, window_params = [{transform_indices = @transform_0, window_bounds = array<i64: 1, 8, 32>}, {pipeline_mode = #tpu.pipeline_mode<synchronous>, transform_indices = @transform_1, window_bounds = array<i64: 32, 96>}, {pipeline_mode = #tpu.pipeline_mode<synchronous>, transform_indices = @transform_2, window_bounds = array<i64: 1, 96>}, {pipeline_mode = #tpu.pipeline_mode<synchronous>, transform_indices = @transform_3, window_bounds = array<i64: 32, 32>}, {pipeline_mode = #tpu.pipeline_mode<synchronous>, transform_indices = @transform_4, window_bounds = array<i64: 1, 32>}, {transform_indices = @transform_5, window_bounds = array<i64: 1, 8, 32>}]} {
    %c0 = arith.constant 0 : index
    %c0_0 = arith.constant 0 : index
    %c0_1 = arith.constant 0 : index
    %0 = vector.load %arg1[%c0, %c0_0, %c0_1] : memref<1x8x32xf32, #tpu.memory_space<vmem>>, vector<1x8x32xf32>
    %1 = vector.shape_cast %0 : vector<1x8x32xf32> to vector<8x32xf32>
    %2 = arith.truncf %1 : vector<8x32xf32> to vector<8x32xbf16>
    %c0_2 = arith.constant 0 : index
    %c0_3 = arith.constant 0 : index
    %3 = vector.load %arg2[%c0_2, %c0_3] : memref<32x96xbf16, #tpu.memory_space<vmem>>, vector<32x96xbf16>
    %cst = arith.constant dense<0.000000e+00> : vector<8x96xf32>
    %4 = tpu.matmul %2, %3, %cst {dimension_numbers = #tpu.dot_dimension_numbers<[1], [0], [0], [1], [0, 0, 1, 1], [], []>} : vector<8x32xbf16>, vector<32x96xbf16>, vector<8x96xf32> -> vector<8x96xf32>
    %c0_4 = arith.constant 0 : index
    %c0_5 = arith.constant 0 : index
    %5 = vector.load %arg3[%c0_4, %c0_5] : memref<1x96xf32, #tpu.memory_space<vmem>>, vector<1x96xf32>
    %6 = vector.broadcast %5 : vector<1x96xf32> to vector<8x96xf32>
    %7 = arith.addf %4, %6 : vector<8x96xf32>
    %8 = vector.extract_strided_slice %7 {offsets = [0, 0], sizes = [8, 32], strides = [1, 1]} : vector<8x96xf32> to vector<8x32xf32>
    %cst_6 = arith.constant 0.353553385 : f32
    %9 = vector.broadcast %cst_6 : f32 to vector<8x32xf32>
    %10 = arith.mulf %8, %9 : vector<8x32xf32>
    %11 = arith.truncf %10 : vector<8x32xf32> to vector<8x32xbf16>
    %12 = vector.extract_strided_slice %7 {offsets = [0, 32], sizes = [8, 32], strides = [1, 1]} : vector<8x96xf32> to vector<8x32xf32>
    %13 = arith.truncf %12 : vector<8x32xf32> to vector<8x32xbf16>
    %14 = vector.extract_strided_slice %7 {offsets = [0, 64], sizes = [8, 32], strides = [1, 1]} : vector<8x96xf32> to vector<8x32xf32>
    %15 = arith.truncf %14 : vector<8x32xf32> to vector<8x32xbf16>
    %16 = vector.extract_strided_slice %11 {offsets = [0, 0], sizes = [8, 8], strides = [1, 1]} : vector<8x32xbf16> to vector<8x8xbf16>
    %17 = vector.extract_strided_slice %13 {offsets = [0, 0], sizes = [8, 8], strides = [1, 1]} : vector<8x32xbf16> to vector<8x8xbf16>
    %18 = vector.extract_strided_slice %15 {offsets = [0, 0], sizes = [8, 8], strides = [1, 1]} : vector<8x32xbf16> to vector<8x8xbf16>
    %19 = tpu.transpose %17, [1, 0] : vector<8x8xbf16> -> vector<8x8xbf16>
    %cst_7 = arith.constant dense<0.000000e+00> : vector<8x8xf32>
    %20 = tpu.matmul %16, %19, %cst_7 {dimension_numbers = #tpu.dot_dimension_numbers<[1], [0], [0], [1], [0, 0, 1, 1], [], []>} : vector<8x8xbf16>, vector<8x8xbf16>, vector<8x8xf32> -> vector<8x8xf32>
    %cst_8 = arith.constant dense<0xFF800000> : vector<8xf32>
    %21 = vector.multi_reduction <maximumf>, %20, %cst_8 [1] : vector<8x8xf32> to vector<8xf32>
    %22 = vector.shape_cast %21 : vector<8xf32> to vector<8x1xf32>
    %23 = vector.broadcast %22 : vector<8x1xf32> to vector<8x8xf32>
    %24 = arith.subf %20, %23 : vector<8x8xf32>
    %25 = math.exp %24 : vector<8x8xf32>
    %cst_9 = arith.constant dense<0.000000e+00> : vector<8xf32>
    %26 = vector.multi_reduction <add>, %25, %cst_9 [1] : vector<8x8xf32> to vector<8xf32>
    %27 = vector.shape_cast %26 : vector<8xf32> to vector<8x1xf32>
    %28 = arith.truncf %25 : vector<8x8xf32> to vector<8x8xbf16>
    %cst_10 = arith.constant dense<0.000000e+00> : vector<8x8xf32>
    %29 = tpu.matmul %28, %18, %cst_10 {dimension_numbers = #tpu.dot_dimension_numbers<[1], [0], [0], [1], [0, 0, 1, 1], [], []>} : vector<8x8xbf16>, vector<8x8xbf16>, vector<8x8xf32> -> vector<8x8xf32>
    %30 = tpu.reciprocal %27 {approx = true} : vector<8x1xf32> -> vector<8x1xf32>
    %31 = vector.broadcast %30 : vector<8x1xf32> to vector<8x8xf32>
    %32 = arith.mulf %29, %31 : vector<8x8xf32>
    %33 = arith.truncf %32 : vector<8x8xf32> to vector<8x8xbf16>
    %c0_11 = arith.constant 0 : index
    %c0_12 = arith.constant 0 : index
    %34 = vector.load %arg7[%c0_11, %c0_12] : memref<8x32xbf16, #tpu.memory_space<vmem>>, vector<8x8xbf16>
    tpu.vector_store %arg7[%c0_11, %c0_12], %33 {strides = array<i32>} : memref<8x32xbf16, #tpu.memory_space<vmem>>, vector<8x8xbf16>,
    %35 = vector.extract_strided_slice %11 {offsets = [0, 8], sizes = [8, 8], strides = [1, 1]} : vector<8x32xbf16> to vector<8x8xbf16>
    %36 = vector.extract_strided_slice %13 {offsets = [0, 8], sizes = [8, 8], strides = [1, 1]} : vector<8x32xbf16> to vector<8x8xbf16>
    %37 = vector.extract_strided_slice %15 {offsets = [0, 8], sizes = [8, 8], strides = [1, 1]} : vector<8x32xbf16> to vector<8x8xbf16>
    %38 = tpu.transpose %36, [1, 0] : vector<8x8xbf16> -> vector<8x8xbf16>
    %cst_13 = arith.constant dense<0.000000e+00> : vector<8x8xf32>
    %39 = tpu.matmul %35, %38, %cst_13 {dimension_numbers = #tpu.dot_dimension_numbers<[1], [0], [0], [1], [0, 0, 1, 1], [], []>} : vector<8x8xbf16>, vector<8x8xbf16>, vector<8x8xf32> -> vector<8x8xf32>
    %cst_14 = arith.constant dense<0xFF800000> : vector<8xf32>
    %40 = vector.multi_reduction <maximumf>, %39, %cst_14 [1] : vector<8x8xf32> to vector<8xf32>
    %41 = vector.shape_cast %40 : vector<8xf32> to vector<8x1xf32>
    %42 = vector.broadcast %41 : vector<8x1xf32> to vector<8x8xf32>
    %43 = arith.subf %39, %42 : vector<8x8xf32>
    %44 = math.exp %43 : vector<8x8xf32>
    %cst_15 = arith.constant dense<0.000000e+00> : vector<8xf32>
    %45 = vector.multi_reduction <add>, %44, %cst_15 [1] : vector<8x8xf32> to vector<8xf32>
    %46 = vector.shape_cast %45 : vector<8xf32> to vector<8x1xf32>
    %47 = arith.truncf %44 : vector<8x8xf32> to vector<8x8xbf16>
    %cst_16 = arith.constant dense<0.000000e+00> : vector<8x8xf32>
    %48 = tpu.matmul %47, %37, %cst_16 {dimension_numbers = #tpu.dot_dimension_numbers<[1], [0], [0], [1], [0, 0, 1, 1], [], []>} : vector<8x8xbf16>, vector<8x8xbf16>, vector<8x8xf32> -> vector<8x8xf32>
    %49 = tpu.reciprocal %46 {approx = true} : vector<8x1xf32> -> vector<8x1xf32>
    %50 = vector.broadcast %49 : vector<8x1xf32> to vector<8x8xf32>
    %51 = arith.mulf %48, %50 : vector<8x8xf32>
    %52 = arith.truncf %51 : vector<8x8xf32> to vector<8x8xbf16>
    %c0_17 = arith.constant 0 : index
    %c8 = arith.constant 8 : index
    %53 = vector.load %arg7[%c0_17, %c8] : memref<8x32xbf16, #tpu.memory_space<vmem>>, vector<8x8xbf16>
    tpu.vector_store %arg7[%c0_17, %c8], %52 {strides = array<i32>} : memref<8x32xbf16, #tpu.memory_space<vmem>>, vector<8x8xbf16>,
    %54 = vector.extract_strided_slice %11 {offsets = [0, 16], sizes = [8, 8], strides = [1, 1]} : vector<8x32xbf16> to vector<8x8xbf16>
    %55 = vector.extract_strided_slice %13 {offsets = [0, 16], sizes = [8, 8], strides = [1, 1]} : vector<8x32xbf16> to vector<8x8xbf16>
    %56 = vector.extract_strided_slice %15 {offsets = [0, 16], sizes = [8, 8], strides = [1, 1]} : vector<8x32xbf16> to vector<8x8xbf16>
    %57 = tpu.transpose %55, [1, 0] : vector<8x8xbf16> -> vector<8x8xbf16>
    %cst_18 = arith.constant dense<0.000000e+00> : vector<8x8xf32>
    %58 = tpu.matmul %54, %57, %cst_18 {dimension_numbers = #tpu.dot_dimension_numbers<[1], [0], [0], [1], [0, 0, 1, 1], [], []>} : vector<8x8xbf16>, vector<8x8xbf16>, vector<8x8xf32> -> vector<8x8xf32>
    %cst_19 = arith.constant dense<0xFF800000> : vector<8xf32>
    %59 = vector.multi_reduction <maximumf>, %58, %cst_19 [1] : vector<8x8xf32> to vector<8xf32>
    %60 = vector.shape_cast %59 : vector<8xf32> to vector<8x1xf32>
    %61 = vector.broadcast %60 : vector<8x1xf32> to vector<8x8xf32>
    %62 = arith.subf %58, %61 : vector<8x8xf32>
    %63 = math.exp %62 : vector<8x8xf32>
    %cst_20 = arith.constant dense<0.000000e+00> : vector<8xf32>
    %64 = vector.multi_reduction <add>, %63, %cst_20 [1] : vector<8x8xf32> to vector<8xf32>
    %65 = vector.shape_cast %64 : vector<8xf32> to vector<8x1xf32>
    %66 = arith.truncf %63 : vector<8x8xf32> to vector<8x8xbf16>
    %cst_21 = arith.constant dense<0.000000e+00> : vector<8x8xf32>
    %67 = tpu.matmul %66, %56, %cst_21 {dimension_numbers = #tpu.dot_dimension_numbers<[1], [0], [0], [1], [0, 0, 1, 1], [], []>} : vector<8x8xbf16>, vector<8x8xbf16>, vector<8x8xf32> -> vector<8x8xf32>
    %68 = tpu.reciprocal %65 {approx = true} : vector<8x1xf32> -> vector<8x1xf32>
    %69 = vector.broadcast %68 : vector<8x1xf32> to vector<8x8xf32>
    %70 = arith.mulf %67, %69 : vector<8x8xf32>
    %71 = arith.truncf %70 : vector<8x8xf32> to vector<8x8xbf16>
    %c0_22 = arith.constant 0 : index
    %c16 = arith.constant 16 : index
    %72 = vector.load %arg7[%c0_22, %c16] : memref<8x32xbf16, #tpu.memory_space<vmem>>, vector<8x8xbf16>
    tpu.vector_store %arg7[%c0_22, %c16], %71 {strides = array<i32>} : memref<8x32xbf16, #tpu.memory_space<vmem>>, vector<8x8xbf16>,
    %73 = vector.extract_strided_slice %11 {offsets = [0, 24], sizes = [8, 8], strides = [1, 1]} : vector<8x32xbf16> to vector<8x8xbf16>
    %74 = vector.extract_strided_slice %13 {offsets = [0, 24], sizes = [8, 8], strides = [1, 1]} : vector<8x32xbf16> to vector<8x8xbf16>
    %75 = vector.extract_strided_slice %15 {offsets = [0, 24], sizes = [8, 8], strides = [1, 1]} : vector<8x32xbf16> to vector<8x8xbf16>
    %76 = tpu.transpose %74, [1, 0] : vector<8x8xbf16> -> vector<8x8xbf16>
    %cst_23 = arith.constant dense<0.000000e+00> : vector<8x8xf32>
    %77 = tpu.matmul %73, %76, %cst_23 {dimension_numbers = #tpu.dot_dimension_numbers<[1], [0], [0], [1], [0, 0, 1, 1], [], []>} : vector<8x8xbf16>, vector<8x8xbf16>, vector<8x8xf32> -> vector<8x8xf32>
    %cst_24 = arith.constant dense<0xFF800000> : vector<8xf32>
    %78 = vector.multi_reduction <maximumf>, %77, %cst_24 [1] : vector<8x8xf32> to vector<8xf32>
    %79 = vector.shape_cast %78 : vector<8xf32> to vector<8x1xf32>
    %80 = vector.broadcast %79 : vector<8x1xf32> to vector<8x8xf32>
    %81 = arith.subf %77, %80 : vector<8x8xf32>
    %82 = math.exp %81 : vector<8x8xf32>
    %cst_25 = arith.constant dense<0.000000e+00> : vector<8xf32>
    %83 = vector.multi_reduction <add>, %82, %cst_25 [1] : vector<8x8xf32> to vector<8xf32>
    %84 = vector.shape_cast %83 : vector<8xf32> to vector<8x1xf32>
    %85 = arith.truncf %82 : vector<8x8xf32> to vector<8x8xbf16>
    %cst_26 = arith.constant dense<0.000000e+00> : vector<8x8xf32>
    %86 = tpu.matmul %85, %75, %cst_26 {dimension_numbers = #tpu.dot_dimension_numbers<[1], [0], [0], [1], [0, 0, 1, 1], [], []>} : vector<8x8xbf16>, vector<8x8xbf16>, vector<8x8xf32> -> vector<8x8xf32>
    %87 = tpu.reciprocal %84 {approx = true} : vector<8x1xf32> -> vector<8x1xf32>
    %88 = vector.broadcast %87 : vector<8x1xf32> to vector<8x8xf32>
    %89 = arith.mulf %86, %88 : vector<8x8xf32>
    %90 = arith.truncf %89 : vector<8x8xf32> to vector<8x8xbf16>
    %c0_27 = arith.constant 0 : index
    %c24 = arith.constant 24 : index
    %91 = vector.load %arg7[%c0_27, %c24] : memref<8x32xbf16, #tpu.memory_space<vmem>>, vector<8x8xbf16>
    tpu.vector_store %arg7[%c0_27, %c24], %90 {strides = array<i32>} : memref<8x32xbf16, #tpu.memory_space<vmem>>, vector<8x8xbf16>,
    %c0_28 = arith.constant 0 : index
    %c0_29 = arith.constant 0 : index
    %92 = vector.load %arg7[%c0_28, %c0_29] : memref<8x32xbf16, #tpu.memory_space<vmem>>, vector<8x32xbf16>
    %c0_30 = arith.constant 0 : index
    %c0_31 = arith.constant 0 : index
    %93 = vector.load %arg4[%c0_30, %c0_31] : memref<32x32xbf16, #tpu.memory_space<vmem>>, vector<32x32xbf16>
    %cst_32 = arith.constant dense<0.000000e+00> : vector<8x32xf32>
    %94 = tpu.matmul %92, %93, %cst_32 {dimension_numbers = #tpu.dot_dimension_numbers<[1], [0], [0], [1], [0, 0, 1, 1], [], []>} : vector<8x32xbf16>, vector<32x32xbf16>, vector<8x32xf32> -> vector<8x32xf32>
    %c0_33 = arith.constant 0 : index
    %c0_34 = arith.constant 0 : index
    %95 = vector.load %arg5[%c0_33, %c0_34] : memref<1x32xf32, #tpu.memory_space<vmem>>, vector<1x32xf32>
    %96 = vector.broadcast %95 : vector<1x32xf32> to vector<8x32xf32>
    %97 = arith.addf %94, %96 : vector<8x32xf32>
    %c0_35 = arith.constant 0 : index
    %c0_36 = arith.constant 0 : index
    %c0_37 = arith.constant 0 : index
    %98 = vector.load %arg6[%c0_35, %c0_36, %c0_37] : memref<1x8x32xf32, #tpu.memory_space<vmem>>, vector<1x8x32xf32>
    %99 = vector.shape_cast %98 : vector<1x8x32xf32> to vector<8x32xf32>
    %100 = vector.shape_cast %97 : vector<8x32xf32> to vector<1x8x32xf32>
    tpu.vector_store %arg6[%c0_35, %c0_36, %c0_37], %100 {strides = array<i32>} : memref<1x8x32xf32, #tpu.memory_space<vmem>>, vector<1x8x32xf32>,
    return
  }
  func.func @transform_0(%arg0: i32) -> (i32, i32, i32) {
    %c0_i32 = arith.constant 0 : i32
    %c0_i32_0 = arith.constant 0 : i32
    %c0_i32_1 = arith.constant 0 : i32
    return %arg0, %c0_i32, %c0_i32_0 : i32, i32, i32
  }
  func.func @transform_1(%arg0: i32) -> (i32, i32) {
    %c0_i32 = arith.constant 0 : i32
    %c0_i32_0 = arith.constant 0 : i32
    %c0_i32_1 = arith.constant 0 : i32
    return %c0_i32, %c0_i32_0 : i32, i32
  }
  func.func @transform_2(%arg0: i32) -> (i32, i32) {
    %c0_i32 = arith.constant 0 : i32
    %c0_i32_0 = arith.constant 0 : i32
    %c0_i32_1 = arith.constant 0 : i32
    return %c0_i32, %c0_i32_0 : i32, i32
  }
  func.func @transform_3(%arg0: i32) -> (i32, i32) {
    %c0_i32 = arith.constant 0 : i32
    %c0_i32_0 = arith.constant 0 : i32
    %c0_i32_1 = arith.constant 0 : i32
    return %c0_i32, %c0_i32_0 : i32, i32
  }
  func.func @transform_4(%arg0: i32) -> (i32, i32) {
    %c0_i32 = arith.constant 0 : i32
    %c0_i32_0 = arith.constant 0 : i32
    %c0_i32_1 = arith.constant 0 : i32
    return %c0_i32, %c0_i32_0 : i32, i32
  }
  func.func @transform_5(%arg0: i32) -> (i32, i32, i32) {
    %c0_i32 = arith.constant 0 : i32
    %c0_i32_0 = arith.constant 0 : i32
    %c0_i32_1 = arith.constant 0 : i32
    return %arg0, %c0_i32, %c0_i32_0 : i32, i32, i32
  }
}

</mosaic_0001>

<bundles_post_ra>
// kernel: tpu_custom_call.1
= control target key start
LH: loop header
LB: loop body
LE: loop exit
PB: predicated region body
PF: predicated region fallthrough
CT: control target
= control target key end

     0   :  { %10 = vsyncpa [#allocation4], 0  ;;  %s1732_s0 = inlined_call_operand.hbm [shape: f32[2,8,32], index: 0, kind: input, shape index: {}]   ;;  %s1733_s1 = inlined_call_operand.hbm [shape: bf16[32,96], index: 1, kind: input, shape index: {}]   ;;  %s1734_s2 = inlined_call_operand.vmem [shape: f32[1,96], index: 2, kind: input, shape index: {}]   ;;  %s1735_s3 = inlined_call_operand.hbm [shape: bf16[32,32], index: 3, kind: input, shape index: {}]   ;;  %s1736_s4 = inlined_call_operand.vmem [shape: f32[1,32], index: 4, kind: input, shape index: {}]   ;;  %s1737_s5 = inlined_call_operand.hbm [shape: f32[2,8,32], index: 5, kind: output, shape index: {}]  }
   0x1   :  { %12 = vsyncpa [#allocation4 + $0x1], 0 }
   0x2   :  { %13 = vsyncpa [#allocation7], 0 }
   0x3   :  { %14 = vsyncpa [#allocation5], 0 }
   0x4   :  { %16 = vsyncpa [#allocation5 + $0x1], 0  ;;  %s1424_s18 = smov 0   ;;  %s1426_s19 = smov 0  }
   0x5   :  { %s1428_s20 = smov 0   ;;  %s1430_s21 = smov 0  }
   0x6 LB: > { %s1445_s22 = sadd.s32 4294967295, %s1370_s21   ;;  %s985_s23 = sadd.s32 4294967294, %s1370_s21   ;;  %s1370_s21 = sphi %s1430_s21, %s1757_s21   ;;  %s1366_s20 = sphi %s1428_s20, %s1756_s20   ;;  %s1362_s19 = sphi %s1426_s19, %s1755_s19   ;;  %s1358_s18 = sphi %s1424_s18, %s1754_s18  }
   0x7   : > { %p42_p0 = scmp.ne.s32.totalorder %s1362_s19, %s1358_s18  ;;  %p1738_p1 = scmp.eq.s32.totalorder %s1445_s22, 0 }
   0x8   : > { %p156_p3 = scmp.eq.s32.totalorder %s985_s23, 1  ;;  %p986_p5 = scmp.ge.s32.totalorder %s1370_s21, 1 }
   0x9   : > { %p1454_p4 = por %p1738_p1, %p42_p0  ;;  %p163_p7 = scmp.lt.s32.totalorder %s1370_s21, 3 }
   0xa   : > { %p1459_p6 = por %p156_p3, %p42_p0  ;;  %s1372_s27 = smov [#allocation6]  }
   0xb   : > { %s1741_s24 = scalar_select %p1454_p4, 1, 0 }
   0xc   : > { %s1742_s25 = scalar_select %p1459_p6, 1, 0 }
   0xd   : > { %p1464_p8 = pnand %p986_p5, %p163_p7  ;;  %s175_s28 = sshll.u32 %s1372_s27, 4  ;;  %s1468_s28 = int_to_ptr.vmem [resolvable:$true] %s175_s28 }
   0xe   : > { %s1373_s30 = smov [#allocation8]   ;;  %s1214_s9 = scalar_lea.hbm %s1733_s1, 256 }
   0xf   : > { %p1121_p9 = pneg %p1464_p8  ;;  %s191_s6 = sshll.u32 %s1373_s30, 4  ;;  %s1479_s6 = int_to_ptr.vmem [resolvable:$true] %s191_s6 }
  0x10   : > { %p1215_p12 = scmp.ne.s32.totalorder %s1733_s1, %s1214_s9  ;;  %p1221_p5 = scmp.lt.u32.totalorder %s1214_s9, %s1733_s1 }
  0x11   : > { %p1475_p11 = pnand %p1121_p9, %p1738_p1 }
  0x13   : > { %p1216_p13 = pneg %p1475_p11 }
  0x15   : > { %p1217_p0 = pnand %p1216_p13, %p1215_p12 }
  0x17   : > { %p1218_p3 = pneg %p1217_p0 }
  0x19   : > { %p1223_p7 = pnand %p1221_p5, %p1218_p3 }
  0x1b   : > { %1226 = shalt.err (!%p1223_p7)
}
  0x1c   : > { %s1227_s14 = scalar_lea.vmem %s1468_s28, 256  ;;  %p1235_p2 = scmp.lt.s32.totalorder %s1468_s28, %s1468_s28 }
  0x1d   : > { %p1228_p9 = scmp.ne.s32.totalorder %s1468_s28, %s1227_s14  ;;  %p1236_p12 = scmp.lt.s32.totalorder %s1227_s14, %s1227_s14 }
  0x1f   : > { %p1230_p10 = pnand %p1228_p9, %p1216_p13  ;;  %p1237_p0 = por %p1236_p12, %p1235_p2 }
  0x21   : > { %p1231_p1 = pneg %p1230_p10 }
  0x23   : > { %p1238_p6 = pnand %p1237_p0, %p1231_p1 }
  0x25   : > { %1241 = shalt.err (!%p1238_p6)
}
  0x26   : > { %s1374_s15 = smov 64   ;;  %s1375_s16 = smov 4  }
  0x27   : > { %1124 = dma.hbm_to_vmem [thread:$0]  (!%p1475_p11), %s1733_s1, 256, %s1468_s28, [#allocation7], %s1374_s15, %s1374_s15, %s1375_s16  }
  0x28   : > { %s1242_s7 = scalar_lea.hbm %s1735_s3, 256 }
  0x29   : > { %p1243_p2 = scmp.ne.s32.totalorder %s1735_s3, %s1242_s7  ;;  %p1249_p10 = scmp.lt.u32.totalorder %s1242_s7, %s1735_s3 }
  0x2b   : > { %p1245_p1 = pnand %p1243_p2, %p1216_p13 }
  0x2d   : > { %p1246_p6 = pneg %p1245_p1 }
  0x2f   : > { %p1251_p3 = pnand %p1249_p10, %p1246_p6 }
  0x31   : > { %1254 = shalt.err (!%p1251_p3)
}
  0x32   : > { %s1255_s28 = scalar_lea.vmem %s1479_s6, 256  ;;  %p1263_p12 = scmp.lt.s32.totalorder %s1479_s6, %s1479_s6 }
  0x33   : > { %p1256_p5 = scmp.ne.s32.totalorder %s1479_s6, %s1255_s28  ;;  %p1264_p0 = scmp.lt.s32.totalorder %s1255_s28, %s1255_s28 }
  0x35   : > { %p1258_p7 = pnand %p1256_p5, %p1216_p13  ;;  %p1265_p2 = por %p1264_p0, %p1263_p12 }
  0x37   : > { %p1259_p9 = pneg %p1258_p7 }
  0x39   : > { %p1266_p1 = pnand %p1265_p2, %p1259_p9 }
  0x3b   : > { %1269 = shalt.err (!%p1266_p1)
}
  0x3c   : > { %1127 = dma.hbm_to_vmem [thread:$0]  (!%p1475_p11), %s1735_s3, 256, %s1479_s6, [#allocation7], %s1374_s15, %s1374_s15, %s1375_s16  }
  0x3d   : > { %s1534_s14 = sadd.s32 1, %s1370_s21   ;;  %s29_s29 = sadd.s32 1, %s1366_s20 }
  0x3e   : > { %s26_s17 = ssub.s32 %s1370_s21, %s1534_s14  ;;  %p36_p13 = scmp.ne.s32.totalorder %s1366_s20, %s1362_s19 }
  0x3f   : > { %p27_p6 = scmp.eq.s32.totalorder %s26_s17, 0  ;;  %p37_p10 = scmp.eq.s32.totalorder %s1370_s21, 0 }
  0x40   : > { %p1745_p3 = scmp.eq.s32.totalorder %s1445_s22, 1  ;;  %p1138_p7 = scmp.lt.s32.totalorder %s1370_s21, 2 }
  0x41   : > { %s1550_s27 = scalar_select %p27_p6, %s1366_s20, %s29_s29  }
  0x42   : > { %p1544_p5 = por %p1745_p3, %p36_p13  ;;  %p38_p9 = por %p37_p10, %p36_p13 }
  0x43   : > { %s208_s30 = sand.u32 1, %s1366_s20   ;;  %s991_s6 = sshll.u32 %s1370_s21, 7 }
  0x44   : > { %s1746_s23 = scalar_select %p1544_p5, 1, 0 }
  0x45   : > { %s990_s7 = sshll.u32 %s208_s30, 3  ;;  %s1557_s8 = scalar_lea.hbm %s1732_s0, %s991_s6 }
  0x46   : > { %s212_s9 = scalar_lea.vmem [#allocation3], %s990_s7  ;;  %p1561_p11 = pnand %p1138_p7, %p38_p9 }
  0x47   : > { %s219_s10 = sshll.u32 %s212_s9, 4  ;;  %s209_s28 = scalar_lea.sflag [#allocation4], %s208_s30  ;;  %s1559_s10 = int_to_ptr.vmem [resolvable:$true] %s219_s10 }
  0x48   : > { %s1270_s12 = scalar_lea.hbm %s1557_s8, 128  ;;  %p1272_p0 = pneg %p1561_p11 }
  0x49   : > { %p1271_p12 = scmp.ne.s32.totalorder %s1557_s8, %s1270_s12  ;;  %s1275_s17 = scalar_lea.hbm %s1732_s0, 256 }
  0x4a   : > { %p1276_p13 = scmp.lt.u32.totalorder %s1557_s8, %s1732_s0  ;;  %p1277_p6 = scmp.lt.u32.totalorder %s1275_s17, %s1270_s12 }
  0x4b   : > { %p1273_p2 = pnand %p1272_p0, %p1271_p12  ;;  %p1279_p3 = scmp.lt.u32.totalorder %s1270_s12, %s1557_s8 }
  0x4c   : > { %p1278_p10 = por %p1277_p6, %p1276_p13 }
  0x4d   : > { %p1274_p1 = pneg %p1273_p2 }
  0x4e   : > { %p1280_p7 = por %p1279_p3, %p1278_p10 }
  0x50   : > { %p1281_p9 = pnand %p1280_p7, %p1274_p1 }
  0x52   : > { %1284 = shalt.err (!%p1281_p9)
}
  0x53   : > { %s1285_s30 = scalar_lea.vmem %s1559_s10, 128  ;;  %s1376_s15 = smov [#allocation3]  }
  0x54   : > { %p1286_p12 = scmp.ne.s32.totalorder %s1559_s10, %s1285_s30  ;;  %s1290_s16 = sshll.u32 %s1376_s15, 4  ;;  %s1291_s16 = int_to_ptr.vmem [resolvable:$false] %s1290_s16 }
  0x55   : > { %s1292_s9 = scalar_lea.vmem %s1291_s16, 256  ;;  %p1293_p4 = scmp.lt.s32.totalorder %s1559_s10, %s1291_s16 }
  0x56   : > { %p1288_p2 = pnand %p1286_p12, %p1272_p0  ;;  %p1294_p13 = scmp.lt.s32.totalorder %s1292_s9, %s1285_s30 }
  0x58   : > { %p1289_p5 = pneg %p1288_p2  ;;  %p1295_p6 = por %p1294_p13, %p1293_p4 }
  0x5a   : > { %p1296_p10 = pnand %p1295_p6, %p1289_p5 }
  0x5c   : > { %1299 = shalt.err (!%p1296_p10)
}
  0x5d   : > { %1131 = dma.hbm_to_vmem [thread:$0]  (!%p1561_p11), %s1557_s8, 128, %s1559_s10, %s209_s28  }
  0x5e   : > { %228 = sbr.rel (%p1464_p8) target bundleno = 1446 (0x5a6), region = 40  ;;  %s1593_s12 = sand.u32 (!%p1464_p8), 1, %s1362_s19  }
  0x5f   : > { %s993_s13 = sshll.u32 (!%p1464_p8), %s1593_s12, 3  ;;  %s231_s29 = scalar_lea.sflag (!%p1464_p8), [#allocation4], %s1593_s12 }
  0x60   : > { %s234_s17 = scalar_lea.vmem (!%p1464_p8), [#allocation3], %s993_s13  ;;  %p1748_p4 = scmp.ne.s32.totalorder (!%p1464_p8), %s1741_s24, 0 }
  0x65   : > { %1345 = dma.done.wait (%p1748_p4), %s231_s29, 128  }
  0x66   : > { %1347 = vsyncadd (%p1748_p4), %s231_s29, 4294967168  ;;  %p1749_p5 = scmp.eq.s32.totalorder %s1445_s22, 0 }
  0x68   : > { %1349 = dma.done.wait (%p1749_p5), [#allocation7], 512   ;;  %p1750_p8 = pmov %p1749_p5 }
  0x69   : > { %v1377_v0 = vmov 0.0   ;;  %vm1378_vm0 = vmmov 0   ;;  %v1194_v1 = vld [vmem:[#allocation6] sm:$0xff]   ;;  %v1195_v2 = vld [vmem:[#allocation6 + $0x8] sm:$0xff]   ;;  %v270_v3 = vld [vmem:[%s234_s17] sm:$0xff]  ;;  %vm295_vm1 = vcmask 261120  }
  0x6a   : > { %1351 = vsyncadd (%p1750_p8), [#allocation7], 4294966784  ;;  %1045 = vmatprep.subr.bf16.mxu0 %v1377_v0  ;;  %1049 = vmatprep.mubr.msk.bf16.mxu0 %vm1378_vm0, %v1377_v0  ;;  %v271_v4 = vpack.c.bf16 %v270_v3, %v270_v3  ;;  %v997_v5 = vld [vmem:[%s1734_s2] ss:$0 sm:$0xff]  ;;  %s1379_s8 = smov 96   ;;  %s1380_s10 = smov 120  }
  0x6b   : > { %1053 = vmatprep.subr.bf16.mxu1 %v1377_v0  ;;  %1055 = vmatprep.mubr.msk.bf16.mxu1 %vm1378_vm0, %v1377_v0  ;;  %s1381_s11 = smov 88   ;;  %s1382_s28 = smov 80   ;;  %vm345_vm2 = vcmask 64512   ;;  %vm407_vm3 = vcmask 1043456   ;;  %vm454_vm4 = vcmask 60416   ;;  %vm574_vm5 = vcmask 126016  }
  0x6c   : > { %1046 = vmatpush3.bf16.msra.mxu0 %v1194_v1  ;;  %s1383_s7 = smov 112   ;;  %s1384_s6 = smov 72   ;;  %vm693_vm6 = vcmask 191616   ;;  %vm812_vm7 = vcmask 257216  }
  0x6d   : > { %1047 = vmatprep.subr.bf16.mxu0 %v1377_v0  ;;  %s1385_s30 = smov 104   ;;  %s1386_s15 = smov 56  }
  0x6e   : > { %s1387_s16 = smov 64   ;;  %s1388_s9 = smov 40  }
  0x6f   : > { %s1389_s29 = smov 48   ;;  %s1390_s17 = smov 8  }
  0x70   : > { %1048 = vmatpush3.bf16.msra.mxu0 %v1195_v2  ;;  %s1391_s24 = smov 16   ;;  %s1392_s26 = smov 24  }
  0x71   : > { %1059 = vmatprep.subr.bf16.mxu0 %v1377_v0  ;;  %p1751_p0 = scmp.ne.s32.totalorder %s1746_s23, 0 }
  0x73   : > { %1050 = vmatmul.mubr.msk.bf16.vlgmr.msra.gmra.mrb[0].mxu0 %vm295_vm1, %v271_v4 }
  0x74   : > { %1061 = vmatprep.mubr.msk.bf16.mxu0 %vm1378_vm0, %v1377_v0 }
 0x146   : > { %v333_v6 = vpop.f32.mrb[0].mxu0 }
 0x147   : > { %v334_v7 = vadd.f32 %v997_v5, %v333_v6  ;;  %v1051_v8 = vpop.f32.mrb[1].mxu0 }
 0x148   : > { %v336_v9 = vpop.f32.mrb[2].mxu0 }
 0x149   : > { %v339_v10 = vmul.f32 0.35355338, %v334_v7  ;;  %v1621_v11 = vpack.c.bf16 %v334_v7, %v334_v7  ;;  %v1052_v12 = vpop.f32.mrb[3].mxu0 }
 0x14b   : > { %v340_v13 = vpack.c.bf16 %v339_v10, %v339_v10  ;;  %343 = vrot.lane.b32.xlu0 %v1621_v11, %s1379_s8 }
 0x14d   : > { %457 = vrot.lane.b32.xlu1 %v340_v13, %s1380_s10 }
 0x14f   : > { %459 = vrot.lane.b32.xlu0 %v1621_v11, %s1381_s11  ;;  %s1017_s11 = sshll.u32 %s1445_s22, 7  ;;  %s883_s22 = scalar_lea.sflag [#allocation5], %s1593_s12 }
 0x151   : > { %578 = vrot.lane.b32.xlu1 %v1621_v11, %s1382_s28  ;;  %s268_s28 = scalar_lea.vmem [#allocation9], %s993_s13 }
 0x153   : > { %576 = vrot.lane.b32.xlu0 %v340_v13, %s1383_s7  ;;  %s896_s7 = sshll.u32 %s268_s28, 4  ;;  %s1689_s7 = int_to_ptr.vmem [resolvable:$true] %s896_s7 }
 0x154   : > { %s1300_s13 = scalar_lea.vmem %s1689_s7, 128 }
 0x155   : > { %697 = vrot.lane.b32.xlu1 %v1621_v11, %s1384_s6  ;;  %p1301_p11 = scmp.ne.s32.totalorder %s1689_s7, %s1300_s13 }
 0x157   : > { %695 = vrot.lane.b32.xlu0 %v340_v13, %s1385_s30  ;;  %p1302_p1 = pnand %p1301_p11, %p1751_p0 }
 0x159   : > { %p1303_p3 = pneg %p1302_p1 }
 0x1bd   : > { %v344_v14 = vpop.permute.xlu0 %343 }
 0x1be   : > { %v350_v15 = vsel %vm345_vm2, %v344_v14, 0 }
 0x1bf   : > { %1054 = vmatpush3.bf16.xpose.msra.mxu1 %v350_v15  ;;  %v458_v17 = vpop.permute.xlu1 %457 }
 0x1c0   : > { %1065 = vmatprep.subr.bf16.mxu1 %v1377_v0 }
 0x1c1   : > { %v460_v16 = vpop.permute.xlu0 %459 }
 0x1c2   : > { %v465_v18 = vsel %vm345_vm2, %v460_v16, 0 }
 0x1c3   : > { %v579_v19 = vpop.permute.xlu1 %578 }
 0x1c4   : > { %v584_v20 = vsel %vm345_vm2, %v579_v19, 0 }
 0x1c5   : > { %v577_v22 = vpop.permute.xlu0 %576 }
 0x1c6   : > { %1056 = vmatmul.mubr.msk.bf16.vlgmr.msra.gmra.mrb[0].mxu1 %vm345_vm2, %v340_v13 }
 0x1c7   : > { %1066 = vmatpush3.bf16.xpose.msra.mxu1 %v465_v18  ;;  %1067 = vmatprep.mubr.msk.bf16.mxu1 %vm1378_vm0, %v1377_v0  ;;  %v698_v21 = vpop.permute.xlu1 %697 }
 0x1c8   : > { %1077 = vmatprep.subr.bf16.mxu1 %v1377_v0  ;;  %v703_v23 = vsel %vm345_vm2, %v698_v21, 0 }
 0x1c9   : > { %v696_v24 = vpop.permute.xlu0 %695 }
 0x1ce   : > { %1068 = vmatmul.mubr.msk.bf16.vlgmr.msra.gmra.mrb[4].mxu1 %vm345_vm2, %v458_v17 }
 0x1cf   : > { %1078 = vmatpush3.bf16.xpose.msra.mxu1 %v584_v20  ;;  %1079 = vmatprep.mubr.msk.bf16.mxu1 %vm1378_vm0, %v1377_v0 }
 0x1d0   : > { %1089 = vmatprep.subr.bf16.mxu1 %v1377_v0 }
 0x1d6   : > { %1080 = vmatmul.mubr.msk.bf16.vlgmr.msra.gmra.mrb[8].mxu1 %vm345_vm2, %v577_v22 }
 0x1d7   : > { %1090 = vmatpush3.bf16.xpose.msra.mxu1 %v703_v23  ;;  %1091 = vmatprep.mubr.msk.bf16.mxu1 %vm1378_vm0, %v1377_v0 }
 0x1d8   : > { %1101 = vmatprep.subr.bf16.mxu1 %v1377_v0 }
 0x1de   : > { %1092 = vmatmul.mubr.msk.bf16.vlgmr.msra.gmra.mrb[12].mxu1 %vm345_vm2, %v696_v24 }
 0x1df   : > { %1105 = vmatprep.mubr.msk.bf16.mxu1 %vm1378_vm0, %v1377_v0 }
 0x299   : > { %v386_v25 = vpop.f32.mrb[0].mxu1 }
 0x29a   : > { %v1057_v26 = vpop.f32.mrb[1].mxu1  ;;  %v392_v27 = vsel %vm345_vm2, %v386_v25, -inf }
 0x29b   : > { %393 = vmax.xlane.f32.xlu1 %v392_v27  ;;  %v389_v28 = vpop.f32.mrb[2].mxu1 }
 0x29c   : > { %v1058_v29 = vpop.f32.mrb[3].mxu1 }
 0x2a1   : > { %v501_v30 = vpop.f32.mrb[4].mxu1 }
 0x2a2   : > { %v1069_v31 = vpop.f32.mrb[5].mxu1  ;;  %v507_v32 = vsel %vm345_vm2, %v501_v30, -inf }
 0x2a3   : > { %508 = vmax.xlane.f32.xlu0 %v507_v32  ;;  %v504_v33 = vpop.f32.mrb[6].mxu1 }
 0x2a4   : > { %v1070_v34 = vpop.f32.mrb[7].mxu1 }
 0x2a5   : > { %v1196_v34 = vld [vmem:[#allocation8] sm:$0xff]  }
 0x2a6   : > { %1102 = vmatpush3.bf16.msra.mxu1 %v1196_v34 }
 0x2a7   : > { %1103 = vmatprep.subr.bf16.mxu1 %v1377_v0 }
 0x2a9   : > { %v620_v35 = vpop.f32.mrb[8].mxu1 }
 0x2aa   : > { %v1081_v36 = vpop.f32.mrb[9].mxu1  ;;  %v626_v37 = vsel %vm345_vm2, %v620_v35, -inf }
 0x2ab   : > { %627 = vmax.xlane.f32.xlu0 %v626_v37  ;;  %v623_v38 = vpop.f32.mrb[10].mxu1 }
 0x2ac   : > { %517 = vrot.lane.b32.xlu1 %v1621_v11, %s1386_s15  ;;  %v1082_v39 = vpop.f32.mrb[11].mxu1  ;;  %v1197_v38 = vld [vmem:[#allocation8 + $0x8] sm:$0xff]   ;;  %s1687_s15 = scalar_lea.hbm %s1737_s5, %s1017_s11 }
 0x2ad   : > { %1104 = vmatpush3.bf16.msra.mxu1 %v1197_v38 }
 0x2b1   : > { %v739_v40 = vpop.f32.mrb[12].mxu1 }
 0x2b2   : > { %v1093_v41 = vpop.f32.mrb[13].mxu1  ;;  %v745_v44 = vsel %vm345_vm2, %v739_v40, -inf }
 0x2b3   : > { %v742_v42 = vpop.f32.mrb[14].mxu1 }
 0x2b4   : > { %v1094_v43 = vpop.f32.mrb[15].mxu1 }
 0x2c1   : > { %402 = vrot.lane.b32.xlu0 %v1621_v11, %s1387_s16  ;;  %s1393_s16 = smov [#allocation9]  }
 0x2c5   : > { %755 = vrot.lane.b32.xlu0 %v1621_v11, %s1388_s9  ;;  %s1304_s9 = sshll.u32 %s1393_s16, 4  ;;  %s1305_s9 = int_to_ptr.vmem [resolvable:$false] %s1304_s9 }
 0x2c6   : > { %p1307_p7 = scmp.lt.s32.totalorder %s1689_s7, %s1305_s9 }
 0x2d0   : > { %746 = vmax.xlane.f32.xlu1 %v745_v44 }
 0x2e1   : > { %636 = vrot.lane.b32.xlu1 %v1621_v11, %s1389_s29  ;;  %s1306_s29 = scalar_lea.vmem %s1305_s9, 256 }
 0x2e2   : > { %p1308_p9 = scmp.lt.s32.totalorder %s1306_s29, %s1300_s13 }
 0x2e4   : > { %p1309_p12 = por %p1308_p9, %p1307_p7 }
 0x2e6   : > { %p1310_p2 = pnand %p1309_p12, %p1303_p3 }
 0x328   : > { %v394_v45 = vpop.xlane.xlu1 %393 }
 0x329   : > { %v395_v46 = vsub.f32 %v386_v25, %v394_v45 }
 0x32b   : > { %v396_v47 = vmul.f32 1.442695, %v395_v46 }
 0x32c   : > { %v518_v57 = vpop.permute.xlu1 %517 }
 0x32d   : > { %1198 = vpow2.f32 %v396_v47  ;;  %v523_v61 = vsel %vm407_vm3, %v518_v57, 0 }
 0x330   : > { %v509_v48 = vpop.xlane.xlu0 %508 }
 0x331   : > { %v510_v49 = vsub.f32 %v501_v30, %v509_v48 }
 0x333   : > { %v511_v50 = vmul.f32 1.442695, %v510_v49 }
 0x335   : > { %1200 = vpow2.f32 %v511_v50 }
 0x337   : > { %v1199_v54 = vpop.eup %1198 }
 0x338   : > { %v628_v51 = vpop.xlane.xlu0 %627  ;;  %v401_v59 = vpack.c.bf16 %v1199_v54, %v1199_v54  ;;  %v398_v62 = vsel %vm345_vm2, %v1199_v54, 0.0 }
 0x339   : > { %v629_v52 = vsub.f32 %v620_v35, %v628_v51  ;;  %v1012_v51 = vld [vmem:[%s1736_s4] ss:$0 sm:$0xff] }
 0x33b   : > { %v630_v53 = vmul.f32 1.442695, %v629_v52 }
 0x33c   : > { %v403_v55 = vpop.permute.xlu0 %402 }
 0x33d   : > { %1202 = vpow2.f32 %v630_v53  ;;  %v409_v56 = vsel %vm407_vm3, %v403_v55, 0 }
 0x33e   : > { %1060 = vmatpush3.bf16.msra.mxu0 %v409_v56 }
 0x33f   : > { %v1201_v58 = vpop.eup %1200  ;;  %1071 = vmatprep.subr.bf16.mxu0 %v1377_v0 }
 0x340   : > { %v513_v60 = vsel %vm345_vm2, %v1201_v58, 0.0  ;;  %v516_v1 = vpack.c.bf16 %v1201_v58, %v1201_v58  ;;  %v756_v8 = vpop.permute.xlu0 %755 }
 0x341   : > { %1062 = vmatmul.mubr.msk.bf16.vlgmr.msra.gmra.mrb[4].mxu0 %vm345_vm2, %v401_v59  ;;  %514 = vadd.xlane.f32.xlu1 %v513_v60  ;;  %v761_v10 = vsel %vm407_vm3, %v756_v8, 0 }
 0x342   : > { %1072 = vmatpush3.bf16.msra.mxu0 %v523_v61  ;;  %1073 = vmatprep.mubr.msk.bf16.mxu0 %vm1378_vm0, %v1377_v0 }
 0x343   : > { %1083 = vmatprep.subr.bf16.mxu0 %v1377_v0 }
 0x345   : > { %399 = vadd.xlane.f32.xlu1 %v398_v62 }
 0x347   : > { %v1203_v63 = vpop.eup %1202 }
 0x348   : > { %v632_v2 = vsel %vm345_vm2, %v1203_v63, 0.0  ;;  %v635_v9 = vpack.c.bf16 %v1203_v63, %v1203_v63 }
 0x349   : > { %633 = vadd.xlane.f32.xlu0 %v632_v2  ;;  %1074 = vmatmul.mubr.msk.bf16.vlgmr.msra.gmra.mrb[8].mxu0 %vm345_vm2, %v516_v1 }
 0x34a   : > { %1085 = vmatprep.mubr.msk.bf16.mxu0 %vm1378_vm0, %v1377_v0 }
 0x35d   : > { %v747_v3 = vpop.xlane.xlu1 %746 }
 0x35e   : > { %v748_v4 = vsub.f32 %v739_v40, %v747_v3 }
 0x360   : > { %v749_v5 = vmul.f32 1.442695, %v748_v4 }
 0x361   : > { %v637_v6 = vpop.permute.xlu1 %636 }
 0x362   : > { %1204 = vpow2.f32 %v749_v5  ;;  %v642_v7 = vsel %vm407_vm3, %v637_v6, 0 }
 0x363   : > { %1084 = vmatpush3.bf16.msra.mxu0 %v642_v7 }
 0x364   : > { %1095 = vmatprep.subr.bf16.mxu0 %v1377_v0 }
 0x366   : > { %1086 = vmatmul.mubr.msk.bf16.vlgmr.msra.gmra.mrb[12].mxu0 %vm345_vm2, %v635_v9 }
 0x367   : > { %1096 = vmatpush3.bf16.msra.mxu0 %v761_v10  ;;  %1097 = vmatprep.mubr.msk.bf16.mxu0 %vm1378_vm0, %v1377_v0 }
 0x36c   : > { %v1205_v11 = vpop.eup %1204 }
 0x36d   : > { %v751_v12 = vsel %vm345_vm2, %v1205_v11, 0.0  ;;  %v754_v13 = vpack.c.bf16 %v1205_v11, %v1205_v11 }
 0x36e   : > { %752 = vadd.xlane.f32.xlu0 %v751_v12 }
 0x36f   : > { %1098 = vmatmul.mubr.msk.bf16.vlgmr.msra.gmra.mrb[16].mxu0 %vm345_vm2, %v754_v13 }
 0x3ce   : > { %v515_v14 = vpop.xlane.xlu1 %514 }
 0x3d2   : > { %v400_v15 = vpop.xlane.xlu1 %399 }
 0x3d3   : > { %1206 = vrcp.f32 %v400_v15 }
 0x3d4   : > { %1208 = vrcp.f32 %v515_v14 }
 0x3d6   : > { %v634_v30 = vpop.xlane.xlu0 %633 }
 0x3d7   : > { %1210 = vrcp.f32 %v634_v30 }
 0x3dd   : > { %v1207_v16 = vpop.eup %1206 }
 0x3de   : > { %v1209_v23 = vpop.eup %1208 }
 0x3e1   : > { %v1211_v32 = vpop.eup %1210 }
 0x3fb   : > { %v753_v31 = vpop.xlane.xlu0 %752 }
 0x3fc   : > { %1212 = vrcp.f32 %v753_v31 }
 0x406   : > { %v1213_v41 = vpop.eup %1212 }
 0x414   : > { %v445_v17 = vpop.f32.mrb[4].mxu0 }
 0x415   : > { %v452_v18 = vmul.f32 %v1207_v16, %v445_v17  ;;  %v1063_v19 = vpop.f32.mrb[5].mxu0 }
 0x416   : > { %v448_v20 = vpop.f32.mrb[6].mxu0 }
 0x417   : > { %v453_v21 = vpack.c.bf16 %v452_v18, %v452_v18  ;;  %v1064_v22 = vpop.f32.mrb[7].mxu0 }
 0x419   : > { %455 = vst.msk [vmem:[#allocation2] sm:$0xf] %vm454_vm4, %v453_v21 }
 0x41c   : > { %v559_v24 = vpop.f32.mrb[8].mxu0 }
 0x41d   : > { %v566_v25 = vmul.f32 %v1209_v23, %v559_v24  ;;  %v1075_v26 = vpop.f32.mrb[9].mxu0 }
 0x41e   : > { %v562_v27 = vpop.f32.mrb[10].mxu0 }
 0x41f   : > { %v1020_v28 = vpack.c.bf16 %v566_v25, %v566_v25  ;;  %v1076_v29 = vpop.f32.mrb[11].mxu0 }
 0x421   : > { %571 = vrot.lane.b32.xlu0 %v1020_v28, %s1390_s17 }
 0x439   : > { %v678_v33 = vpop.f32.mrb[12].mxu0 }
 0x43a   : > { %v685_v35 = vmul.f32 %v1211_v32, %v678_v33  ;;  %v1087_v36 = vpop.f32.mrb[13].mxu0 }
 0x43b   : > { %v681_v37 = vpop.f32.mrb[14].mxu0 }
 0x43c   : > { %v1021_v39 = vpack.c.bf16 %v685_v35, %v685_v35  ;;  %v1088_v40 = vpop.f32.mrb[15].mxu0 }
 0x43e   : > { %690 = vrot.lane.b32.xlu1 %v1021_v39, %s1391_s24 }
 0x442   : > { %v797_v42 = vpop.f32.mrb[16].mxu0 }
 0x443   : > { %v804_v43 = vmul.f32 %v1213_v41, %v797_v42  ;;  %v1099_v44 = vpop.f32.mrb[17].mxu0 }
 0x444   : > { %v800_v45 = vpop.f32.mrb[18].mxu0 }
 0x445   : > { %v1022_v46 = vpack.c.bf16 %v804_v43, %v804_v43  ;;  %v1100_v47 = vpop.f32.mrb[19].mxu0 }
 0x447   : > { %809 = vrot.lane.b32.xlu1 %v1022_v46, %s1392_s26 }
 0x493   : > { %v572_v48 = vpop.permute.xlu0 %571 }
 0x494   : > { %575 = vst.msk [vmem:[#allocation2] sm:$0xf] %vm574_vm5, %v572_v48 }
 0x4b0   : > { %v691_v49 = vpop.permute.xlu1 %690 }
 0x4b1   : > { %694 = vst.msk [vmem:[#allocation2] sm:$0xf] %vm693_vm6, %v691_v49 }
 0x4b9   : > { %v810_v0 = vpop.permute.xlu1 %809 }
 0x4ba   : > { %813 = vst.msk [vmem:[#allocation2] sm:$0xf] %vm812_vm7, %v810_v0 }
 0x4c1   : > { %v814_v50 = vld [vmem:[#allocation2] sm:$0xf] }
 0x4c2   : > { %1106 = vmatmul.mubr.msk.bf16.vlgmr.msra.gmra.mrb[16].mxu1 %vm295_vm1, %v814_v50 }
 0x595   : > { %v875_v52 = vpop.f32.mrb[16].mxu1 }
 0x596   : > { %v876_v53 = vadd.f32 %v1012_v51, %v875_v52  ;;  %v1107_v54 = vpop.f32.mrb[17].mxu1 }
 0x597   : > { %v878_v55 = vpop.f32.mrb[18].mxu1 }
 0x598   : > { %v1108_v56 = vpop.f32.mrb[19].mxu1  ;;  %881 = vst.msk [vmem:[%s268_s28] sm:$0xff] %vm295_vm1, %v876_v53 }
 0x599   : > { %1313 = shalt.err (!%p1310_p2)
}
 0x59a   : > { %s1314_s12 = scalar_lea.hbm %s1687_s15, 128  ;;  %s1318_s26 = scalar_lea.hbm %s1737_s5, 256 }
 0x59b   : > { %p1315_p13 = scmp.ne.s32.totalorder %s1687_s15, %s1314_s12  ;;  %p1319_p4 = scmp.lt.u32.totalorder %s1687_s15, %s1737_s5 }
 0x59c   : > { %p1320_p5 = scmp.lt.u32.totalorder %s1318_s26, %s1314_s12  ;;  %p1322_p11 = scmp.lt.u32.totalorder %s1314_s12, %s1687_s15 }
 0x59d   : > { %p1316_p6 = pnand %p1315_p13, %p1751_p0 }
 0x59e   : > { %p1321_p8 = por %p1320_p5, %p1319_p4 }
 0x59f   : > { %p1317_p10 = pneg %p1316_p6 }
 0x5a0   : > { %p1323_p1 = por %p1322_p11, %p1321_p8 }
 0x5a2   : > { %p1324_p3 = pnand %p1323_p1, %p1317_p10 }
 0x5a4   : > { %1327 = shalt.err (!%p1324_p3)
}
 0x5a5   : > { %1119 = dma.vmem_to_hbm [thread:$0]  (%p1751_p0), %s1689_s7, 128, %s1687_s15, %s883_s22  }
 0x5a6 PF: > { %s908_s11 = sand.u32 1, %s1358_s18   ;;  %p1752_p7 = scmp.ne.s32.totalorder %s1742_s25, 0 }
 0x5a7   : > { %p1753_p9 = scmp.ge.s32.totalorder %s1370_s21, 2  ;;  %s909_s28 = scalar_lea.sflag [#allocation5], %s908_s11 }
 0x5a9   : > { %p1133_p12 = pnand %p1753_p9, %p1752_p7 }
 0x5ab   : > { %1353 = dma.done.wait (!%p1133_p12), %s909_s28, 128  }
 0x5ac   : > { %1355 = vsyncadd (!%p1133_p12), %s909_s28, 4294967168  ;;  %p19_p2 = scmp.ge.s32.totalorder %s1534_s14, 4   ;;  %s1754_s18 = smov %s1362_s19 }
 0x5ad   : > { %s1755_s19 = smov %s1366_s20  ;;  %s1756_s20 = smov %s1550_s27 }
 0x5ae   : > { %s1757_s21 = smov %s1534_s14  ;;  %21 = sbr.rel (!%p19_p2) target bundleno = 6 (0x6), region = 93 }
 0x5b5   :  { %914 = vsyncpa [#allocation4], 1 }
 0x5b6   :  { %916 = vsyncpa [#allocation4 + $0x1], 1 }
 0x5b7   :  { %917 = vsyncpa [#allocation7], 1 }
 0x5b8   :  { %918 = vsyncpa [#allocation5], 1 }
 0x5b9   :  { %920 = vsyncpa [#allocation5 + $0x1], 1 }

</bundles_post_ra>
